<compile_context>
chip_gen: v6e
topology: v6e:2x2x1
jax: 0.10.0
libtpu: 0.0.40
codegen_flags: <defaults>
</compile_context>

<pallas_src>
import functools
import math

import jax
import jax.numpy as jnp
from jax.experimental import pallas as pl
from jax.experimental.pallas import tpu as pltpu


# ----------------------------------------------------------------------------
# Layout constants
# ----------------------------------------------------------------------------
H = 100            # logical hidden width (matches the torch module)
HP = 128           # padded hidden width (one full lane tile)
FEAT = 128         # padded feature width for state / eps / output slab
W1_OFF = 0         # weights-slab row offsets
W2_OFF = HP        # 128
W3_OFF = 3 * HP    # 384
W_ROWS = 5 * HP    # 640
VALUE_LANE = 64    # output-slab lane carrying the value head
LOGP_LANE = 65     # output-slab lane carrying sum(log_prob)


# ----------------------------------------------------------------------------
# Kernel: whole forward in VMEM, no grid (total footprint < 1 MiB).
# ----------------------------------------------------------------------------
def _ppo_fused_kernel(x_ref, w_ref, b_ref, eps_ref, out_ref, *, action_dim):
    A = action_dim
    x = x_ref[...]                                    # (Bp, 128)
    eps = eps_ref[...]                                # (Bp, 128), zero outside [0, A)

    w1 = w_ref[W1_OFF:W1_OFF + HP, :]                 # (128, 256)  [pw1 | vw1]
    w2 = w_ref[W2_OFF:W2_OFF + 2 * HP, :]             # (256, 256)  blockdiag(pw2, vw2)
    w3 = w_ref[W3_OFF:W3_OFF + 2 * HP, 0:HP]          # (256, 128)  pw3->[:,0:A], vw3->[:,64]
    b1 = b_ref[0:1, :]                                # (1, 256)
    b2 = b_ref[1:2, :]                                # (1, 256)
    b3 = b_ref[2:3, 0:HP]                             # (1, 128)  pb3 in 0:A, vb3 at lane 64
    std = b_ref[2:3, HP:2 * HP]                       # (1, 128)  raw std in lanes 0:A

    # ---- layer 1 (both heads share x, both use ReLU) --------------------------
    h1 = jnp.maximum(
        jnp.dot(x, w1, preferred_element_type=jnp.float32) + b1, 0.0)

    # ---- layer 2 (block-diagonal); policy half: tanh->relu, value half: relu --
    z2 = jnp.dot(h1, w2, preferred_element_type=jnp.float32) + b2
    lane2 = jax.lax.broadcasted_iota(jnp.int32, z2.shape, 1)
    h2 = jnp.maximum(jnp.where(lane2 < HP, jnp.tanh(z2), z2), 0.0)

    # ---- layer 3: lanes [0,A) = pre-tanh mean, lane VALUE_LANE = value --------
    z3 = jnp.dot(h2, w3, preferred_element_type=jnp.float32) + b3   # (Bp, 128)

    lane = jax.lax.broadcasted_iota(jnp.int32, z3.shape, 1)
    mean = jnp.where(lane < A, jnp.tanh(z3), 0.0)
    value = jnp.where(lane == VALUE_LANE, z3, 0.0)

    # ---- Normal(mean, softplus(std)): sample + log_prob -----------------------
    scale = jax.nn.softplus(std)                       # (1, 128)
    action = mean + scale * eps                        # eps is 0 outside [0, A)

    lane_row = jax.lax.broadcasted_iota(jnp.int32, std.shape, 1)
    const = jnp.where(
        lane_row < A,
        -jnp.log(scale) - 0.5 * math.log(2.0 * math.pi),
        0.0)                                           # (1, 128), 0 on padded lanes
    logp_lane = -0.5 * (eps * eps) + const             # padded lanes contribute 0
    logp_sum = jnp.sum(logp_lane, axis=1, keepdims=True)            # (Bp, 1)
    logp = jnp.where(lane == LOGP_LANE, logp_sum, 0.0)

    # Single lane-dense (Bp, 128) store: action | value | logp packed by lane.
    out_ref[...] = action + value + logp


# ----------------------------------------------------------------------------
# Parameter setup / packing (plain-JAX glue, done once at init time)
# ----------------------------------------------------------------------------
def init_params(key, state_dim, action_dim):
    """Deterministic init mimicking nn.Linear default (uniform +-1/sqrt(fan_in))."""
    def linear(k, fan_in, fan_out):
        kw, kb = jax.random.split(k)
        bound = 1.0 / math.sqrt(fan_in)
        w = jax.random.uniform(kw, (fan_in, fan_out), jnp.float32, -bound, bound)
        b = jax.random.uniform(kb, (fan_out,), jnp.float32, -bound, bound)
        return w, b

    keys = jax.random.split(key, 6)
    pw1, pb1 = linear(keys[0], state_dim, H)
    pw2, pb2 = linear(keys[1], H, H)
    pw3, pb3 = linear(keys[2], H, action_dim)
    vw1, vb1 = linear(keys[3], state_dim, H)
    vw2, vb2 = linear(keys[4], H, H)
    vw3, vb3 = linear(keys[5], H, 1)
    std = jnp.zeros((action_dim,), jnp.float32)        # nn.Parameter(torch.zeros(A))
    return dict(pw1=pw1, pb1=pb1, pw2=pw2, pb2=pb2, pw3=pw3, pb3=pb3,
                vw1=vw1, vb1=vb1, vw2=vw2, vb2=vb2, vw3=vw3, vb3=vb3, std=std)


def pack_params(p, state_dim, action_dim):
    """Pack all weights/biases/std into two lane-dense f32 slabs."""
    S, A = state_dim, action_dim
    assert S <= FEAT and A <= VALUE_LANE

    W = jnp.zeros((W_ROWS, 2 * HP), jnp.float32)                     # (640, 256)
    # layer 1: [pw1 | vw1]
    W = W.at[W1_OFF:W1_OFF + S, 0:H].set(p["pw1"])
    W = W.at[W1_OFF:W1_OFF + S, HP:HP + H].set(p["vw1"])
    # layer 2: blockdiag(pw2, vw2)
    W = W.at[W2_OFF:W2_OFF + H, 0:H].set(p["pw2"])
    W = W.at[W2_OFF + HP:W2_OFF + HP + H, HP:HP + H].set(p["vw2"])
    # layer 3: pw3 -> cols [0, A); vw3 -> col VALUE_LANE
    W = W.at[W3_OFF:W3_OFF + H, 0:A].set(p["pw3"])
    W = W.at[W3_OFF + HP:W3_OFF + HP + H, VALUE_LANE].set(p["vw3"][:, 0])

    Bslab = jnp.zeros((8, 2 * HP), jnp.float32)                      # (8, 256)
    Bslab = Bslab.at[0, 0:H].set(p["pb1"])
    Bslab = Bslab.at[0, HP:HP + H].set(p["vb1"])
    Bslab = Bslab.at[1, 0:H].set(p["pb2"])
    Bslab = Bslab.at[1, HP:HP + H].set(p["vb2"])
    Bslab = Bslab.at[2, 0:A].set(p["pb3"])
    Bslab = Bslab.at[2, VALUE_LANE].set(p["vb3"][0])
    Bslab = Bslab.at[2, HP:HP + A].set(p["std"])
    return W, Bslab


# ----------------------------------------------------------------------------
# Forward wrapper (equivalent of PPOPolicyContinuous.forward(state, stochastic=True))
# ----------------------------------------------------------------------------
def ppo_policy_continuous_forward(state, w_slab, b_slab, eps, action_dim):
    B, S = state.shape
    A = action_dim
    assert A <= VALUE_LANE and S <= FEAT
    Bp = max(8, ((B + 7) // 8) * 8)                    # pad batch to full sublanes

    x = jnp.zeros((Bp, FEAT), jnp.float32).at[:B, :S].set(state)
    e = jnp.zeros((Bp, FEAT), jnp.float32).at[:B, :A].set(eps)

    vmem = pl.BlockSpec(memory_space=pltpu.MemorySpace.VMEM)
    out = pl.pallas_call(
        functools.partial(_ppo_fused_kernel, action_dim=A),
        out_shape=jax.ShapeDtypeStruct((Bp, FEAT), jnp.float32),
        in_specs=[vmem, vmem, vmem, vmem],
        out_specs=vmem,
    )(x, w_slab, b_slab, e)

    value = out[:B, VALUE_LANE]                        # (B,)
    action = out[:B, :A]                               # (B, A)
    logp = out[:B, LOGP_LANE]                          # (B,)
    # torch: value.squeeze(), action.squeeze(), log_prob.sum(1).squeeze()
    return jnp.squeeze(value), jnp.squeeze(action), jnp.squeeze(logp)


# ----------------------------------------------------------------------------
# Pure-JAX reference (for a correctness spot-check)
# ----------------------------------------------------------------------------
def _reference_forward(state, p, eps):
    h = jnp.maximum(state @ p["pw1"] + p["pb1"], 0.0)
    h = jnp.maximum(jnp.tanh(h @ p["pw2"] + p["pb2"]), 0.0)
    mean = jnp.tanh(h @ p["pw3"] + p["pb3"])
    v = jnp.maximum(state @ p["vw1"] + p["vb1"], 0.0)
    v = jnp.maximum(v @ p["vw2"] + p["vb2"], 0.0)
    value = (v @ p["vw3"] + p["vb3"])[:, 0]
    scale = jax.nn.softplus(p["std"])
    action = mean + scale * eps
    logp = (-0.5 * eps**2 - jnp.log(scale) - 0.5 * math.log(2.0 * math.pi)).sum(1)
    return value, action, logp


if __name__ == "__main__":
    STATE_DIM = 16
    ACTION_DIM = 4
    BATCH = 2

    key = jax.random.PRNGKey(0)
    k_params, k_state, k_eps = jax.random.split(key, 3)

    raw_params = init_params(k_params, STATE_DIM, ACTION_DIM)
    w_slab, b_slab = pack_params(raw_params, STATE_DIM, ACTION_DIM)

    state = jax.random.normal(k_state, (BATCH, STATE_DIM), jnp.float32)
    eps = jax.random.normal(k_eps, (BATCH, ACTION_DIM), jnp.float32)

    value, action, log_prob = ppo_policy_continuous_forward(
        state, w_slab, b_slab, eps, ACTION_DIM)
    jax.block_until_ready((value, action, log_prob))

    assert value.shape == (BATCH,)
    assert action.shape == (BATCH, ACTION_DIM)
    assert log_prob.shape == (BATCH,)

    # Spot-check against the un-fused pure-JAX reference.
    ref_v, ref_a, ref_lp = _reference_forward(state, raw_params, eps)
    assert jnp.allclose(value, ref_v, rtol=1e-2, atol=1e-2)
    assert jnp.allclose(action, ref_a, rtol=1e-2, atol=1e-2)
    assert jnp.allclose(log_prob, ref_lp, rtol=1e-2, atol=1e-2)

    print("KERNEL_OK")
</pallas_src>

<mosaic_0001>
module attributes {stable_mosaic.version = 11 : i64} {
  func.func @_ppo_fused_kernel(%arg0: memref<8x128xf32, #tpu.memory_space<vmem>>, %arg1: memref<640x256xf32, #tpu.memory_space<vmem>>, %arg2: memref<8x256xf32, #tpu.memory_space<vmem>>, %arg3: memref<8x128xf32, #tpu.memory_space<vmem>>, %arg4: memref<8x128xf32, #tpu.memory_space<vmem>>) attributes {dimension_semantics = [], scalar_prefetch = 0 : i64, scratch_operands = 0 : i64, tpu.core_type = #tpu.core_type<tc>} {
    %c0 = arith.constant 0 : index
    %c0_0 = arith.constant 0 : index
    %0 = vector.load %arg0[%c0, %c0_0] : memref<8x128xf32, #tpu.memory_space<vmem>>, vector<8x128xf32>
    %c0_1 = arith.constant 0 : index
    %c0_2 = arith.constant 0 : index
    %1 = vector.load %arg3[%c0_1, %c0_2] : memref<8x128xf32, #tpu.memory_space<vmem>>, vector<8x128xf32>
    %c0_3 = arith.constant 0 : index
    %c0_4 = arith.constant 0 : index
    %2 = vector.load %arg1[%c0_3, %c0_4] : memref<640x256xf32, #tpu.memory_space<vmem>>, vector<128x256xf32>
    %c128 = arith.constant 128 : index
    %c0_5 = arith.constant 0 : index
    %3 = vector.load %arg1[%c128, %c0_5] : memref<640x256xf32, #tpu.memory_space<vmem>>, vector<256x256xf32>
    %c384 = arith.constant 384 : index
    %c0_6 = arith.constant 0 : index
    %4 = vector.load %arg1[%c384, %c0_6] : memref<640x256xf32, #tpu.memory_space<vmem>>, vector<256x128xf32>
    %c0_7 = arith.constant 0 : index
    %c0_8 = arith.constant 0 : index
    %5 = vector.load %arg2[%c0_7, %c0_8] : memref<8x256xf32, #tpu.memory_space<vmem>>, vector<1x256xf32>
    %c1 = arith.constant 1 : index
    %c0_9 = arith.constant 0 : index
    %6 = vector.load %arg2[%c1, %c0_9] : memref<8x256xf32, #tpu.memory_space<vmem>>, vector<1x256xf32>
    %c2 = arith.constant 2 : index
    %c0_10 = arith.constant 0 : index
    %7 = vector.load %arg2[%c2, %c0_10] : memref<8x256xf32, #tpu.memory_space<vmem>>, vector<1x128xf32>
    %c2_11 = arith.constant 2 : index
    %c128_12 = arith.constant 128 : index
    %8 = vector.load %arg2[%c2_11, %c128_12] : memref<8x256xf32, #tpu.memory_space<vmem>>, vector<1x128xf32>
    %cst = arith.constant dense<0.000000e+00> : vector<8x256xf32>
    %9 = tpu.matmul %0, %2, %cst {dimension_numbers = #tpu.dot_dimension_numbers<[1], [0], [0], [1], [0, 0, 1, 1], [], []>} : vector<8x128xf32>, vector<128x256xf32>, vector<8x256xf32> -> vector<8x256xf32>
    %10 = vector.broadcast %5 : vector<1x256xf32> to vector<8x256xf32>
    %11 = arith.addf %9, %10 : vector<8x256xf32>
    %cst_13 = arith.constant 0.000000e+00 : f32
    %12 = vector.broadcast %cst_13 : f32 to vector<8x256xf32>
    %13 = arith.maximumf %11, %12 : vector<8x256xf32>
    %cst_14 = arith.constant dense<0.000000e+00> : vector<8x256xf32>
    %14 = tpu.matmul %13, %3, %cst_14 {dimension_numbers = #tpu.dot_dimension_numbers<[1], [0], [0], [1], [0, 0, 1, 1], [], []>} : vector<8x256xf32>, vector<256x256xf32>, vector<8x256xf32> -> vector<8x256xf32>
    %15 = vector.broadcast %6 : vector<1x256xf32> to vector<8x256xf32>
    %16 = arith.addf %14, %15 : vector<8x256xf32>
    %17 = tpu.iota {dimensions = array<i32: 1>} : vector<8x256xi32>
    %c128_i32 = arith.constant 128 : i32
    %18 = vector.broadcast %c128_i32 : i32 to vector<8x256xi32>
    %19 = arith.cmpi slt, %17, %18 : vector<8x256xi32>
    %20 = math.tanh %16 : vector<8x256xf32>
    %21 = arith.select %19, %20, %16 : vector<8x256xi1>, vector<8x256xf32>
    %cst_15 = arith.constant 0.000000e+00 : f32
    %22 = vector.broadcast %cst_15 : f32 to vector<8x256xf32>
    %23 = arith.maximumf %21, %22 : vector<8x256xf32>
    %cst_16 = arith.constant dense<0.000000e+00> : vector<8x128xf32>
    %24 = tpu.matmul %23, %4, %cst_16 {dimension_numbers = #tpu.dot_dimension_numbers<[1], [0], [0], [1], [0, 0, 1, 1], [], []>} : vector<8x256xf32>, vector<256x128xf32>, vector<8x128xf32> -> vector<8x128xf32>
    %25 = vector.broadcast %7 : vector<1x128xf32> to vector<8x128xf32>
    %26 = arith.addf %24, %25 : vector<8x128xf32>
    %27 = tpu.iota {dimensions = array<i32: 1>} : vector<8x128xi32>
    %c4_i32 = arith.constant 4 : i32
    %28 = vector.broadcast %c4_i32 : i32 to vector<8x128xi32>
    %29 = arith.cmpi slt, %27, %28 : vector<8x128xi32>
    %30 = math.tanh %26 : vector<8x128xf32>
    %cst_17 = arith.constant 0.000000e+00 : f32
    %31 = vector.broadcast %cst_17 : f32 to vector<8x128xf32>
    %32 = arith.select %29, %30, %31 : vector<8x128xi1>, vector<8x128xf32>
    %c64_i32 = arith.constant 64 : i32
    %33 = vector.broadcast %c64_i32 : i32 to vector<8x128xi32>
    %34 = arith.cmpi eq, %27, %33 : vector<8x128xi32>
    %cst_18 = arith.constant 0.000000e+00 : f32
    %35 = vector.broadcast %cst_18 : f32 to vector<8x128xf32>
    %36 = arith.select %34, %26, %35 : vector<8x128xi1>, vector<8x128xf32>
    %cst_19 = arith.constant 0.000000e+00 : f32
    %37 = vector.broadcast %cst_19 : f32 to vector<1x128xf32>
    %38 = arith.maximumf %8, %37 : vector<1x128xf32>
    %39 = vector.broadcast %cst_19 : f32 to vector<1x128xf32>
    %40 = arith.subf %8, %39 : vector<1x128xf32>
    %41 = arith.cmpf one, %40, %40 : vector<1x128xf32>
    %42 = vector.broadcast %cst_19 : f32 to vector<1x128xf32>
    %43 = arith.addf %8, %42 : vector<1x128xf32>
    %44 = math.absf %40 : vector<1x128xf32>
    %cst_20 = arith.constant 0.000000e+00 : f32
    %45 = vector.broadcast %cst_20 : f32 to vector<1x128xf32>
    %46 = arith.subf %45, %44 : vector<1x128xf32>
    %47 = math.exp %46 : vector<1x128xf32>
    %48 = math.log1p %47 : vector<1x128xf32>
    %49 = arith.addf %38, %48 : vector<1x128xf32>
    %50 = arith.select %41, %43, %49 : vector<1x128xi1>, vector<1x128xf32>
    %51 = vector.broadcast %50 : vector<1x128xf32> to vector<8x128xf32>
    %52 = arith.mulf %51, %1 : vector<8x128xf32>
    %53 = arith.addf %32, %52 : vector<8x128xf32>
    %54 = tpu.iota {dimensions = array<i32: 1>} : vector<1x128xi32>
    %c4_i32_21 = arith.constant 4 : i32
    %55 = vector.broadcast %c4_i32_21 : i32 to vector<1x128xi32>
    %56 = arith.cmpi slt, %54, %55 : vector<1x128xi32>
    %57 = math.log %50 : vector<1x128xf32>
    %cst_22 = arith.constant 0.000000e+00 : f32
    %58 = vector.broadcast %cst_22 : f32 to vector<1x128xf32>
    %59 = arith.subf %58, %57 : vector<1x128xf32>
    %cst_23 = arith.constant 0.918938517 : f32
    %60 = vector.broadcast %cst_23 : f32 to vector<1x128xf32>
    %61 = arith.subf %59, %60 : vector<1x128xf32>
    %cst_24 = arith.constant 0.000000e+00 : f32
    %62 = vector.broadcast %cst_24 : f32 to vector<1x128xf32>
    %63 = arith.select %56, %61, %62 : vector<1x128xi1>, vector<1x128xf32>
    %64 = arith.mulf %1, %1 : vector<8x128xf32>
    %cst_25 = arith.constant -5.000000e-01 : f32
    %65 = vector.broadcast %cst_25 : f32 to vector<8x128xf32>
    %66 = arith.mulf %65, %64 : vector<8x128xf32>
    %67 = vector.broadcast %63 : vector<1x128xf32> to vector<8x128xf32>
    %68 = arith.addf %66, %67 : vector<8x128xf32>
    %cst_26 = arith.constant dense<0.000000e+00> : vector<8xf32>
    %69 = vector.multi_reduction <add>, %68, %cst_26 [1] : vector<8x128xf32> to vector<8xf32>
    %70 = vector.shape_cast %69 : vector<8xf32> to vector<8x1xf32>
    %c65_i32 = arith.constant 65 : i32
    %71 = vector.broadcast %c65_i32 : i32 to vector<8x128xi32>
    %72 = arith.cmpi eq, %27, %71 : vector<8x128xi32>
    %cst_27 = arith.constant 0.000000e+00 : f32
    %73 = vector.shape_cast %70 : vector<8x1xf32> to vector<8x1xf32>
    %74 = vector.broadcast %73 : vector<8x1xf32> to vector<8x128xf32>
    %75 = vector.broadcast %cst_27 : f32 to vector<8x128xf32>
    %76 = arith.select %72, %74, %75 : vector<8x128xi1>, vector<8x128xf32>
    %77 = arith.addf %53, %36 : vector<8x128xf32>
    %78 = arith.addf %77, %76 : vector<8x128xf32>
    %c0_28 = arith.constant 0 : index
    %c0_29 = arith.constant 0 : index
    %79 = vector.load %arg4[%c0_28, %c0_29] : memref<8x128xf32, #tpu.memory_space<vmem>>, vector<8x128xf32>
    tpu.vector_store %arg4[%c0_28, %c0_29], %78 {strides = array<i32>} : memref<8x128xf32, #tpu.memory_space<vmem>>, vector<8x128xf32>,
    return
  }
}

</mosaic_0001>

<bundles_post_ra>
// kernel: tpu_custom_call.1
= control target key start
LH: loop header
LB: loop body
LE: loop exit
PB: predicated region body
PF: predicated region fallthrough
CT: control target
= control target key end

     0   :  { %9 = vsyncpa [#allocation3], 0  ;;  %s732_s0 = inlined_call_operand.hbm [shape: f32[8,128], index: 0, kind: input, shape index: {}]   ;;  %s733_s1 = inlined_call_operand.hbm [shape: f32[640,256], index: 1, kind: input, shape index: {}]   ;;  %s734_s2 = inlined_call_operand.hbm [shape: f32[8,256], index: 2, kind: input, shape index: {}]   ;;  %s735_s3 = inlined_call_operand.hbm [shape: f32[8,128], index: 3, kind: input, shape index: {}]   ;;  %s736_s4 = inlined_call_operand.hbm [shape: f32[8,128], index: 4, kind: output, shape index: {}]  }
   0x1   :  { %10 = vsyncpa [#allocation6], 0 }
   0x2   :  { %11 = vsyncpa [#allocation9], 0 }
   0x3   :  { %12 = vsyncpa [#allocation4], 0  ;;  %s668_s15 = smov [#allocation5]  }
   0x4   :  { %s28_s16 = sshll.u32 %s668_s15, 4  ;;  %s29_s16 = int_to_ptr.vmem [resolvable:$true] %s28_s16 }
   0x5   :  { %s568_s17 = scalar_lea.vmem %s29_s16, 20480  ;;  %p573_p1 = scmp.lt.s32.totalorder %s29_s16, %s29_s16 }
   0x6   :  { %p569_p0 = scmp.ne.s32.totalorder %s29_s16, %s568_s17  ;;  %p574_p2 = scmp.lt.s32.totalorder %s568_s17, %s568_s17 }
   0x8   :  { %p575_p3 = por %p574_p2, %p573_p1 }
   0xa   :  { %p576_p4 = pnand %p575_p3, %p569_p0 }
   0xc   :  { %579 = shalt.err (!%p576_p4)
}
   0xd   :  { %s669_s18 = smov 256   ;;  %s670_s19 = smov 16  }
   0xe   :  { %34 = dma.hbm_to_vmem [thread:$0]  %s733_s1, 20480, %s29_s16, [#allocation6], %s669_s18, %s669_s18, %s670_s19  }
   0xf   :  { %s671_s22 = smov [#allocation2]   ;;  %s672_s24 = smov [#allocation7]  }
  0x10   :  { %s19_s23 = sshll.u32 %s671_s22, 4  ;;  %s41_s25 = sshll.u32 %s672_s24, 4  ;;  %s20_s23 = int_to_ptr.vmem [resolvable:$true] %s19_s23  ;;  %s42_s25 = int_to_ptr.vmem [resolvable:$true] %s41_s25 }
  0x11   :  { %s588_s26 = scalar_lea.vmem %s20_s23, 128  ;;  %p593_p6 = scmp.lt.s32.totalorder %s20_s23, %s20_s23 }
  0x12   :  { %p589_p5 = scmp.ne.s32.totalorder %s20_s23, %s588_s26  ;;  %p594_p7 = scmp.lt.s32.totalorder %s588_s26, %s588_s26 }
  0x14   :  { %p595_p8 = por %p594_p7, %p593_p6 }
  0x16   :  { %p596_p9 = pnand %p595_p8, %p589_p5 }
  0x18   :  { %599 = shalt.err (!%p596_p9)
}
  0x19   :  { %22 = dma.hbm_to_vmem [thread:$0]  %s732_s0, 128, %s20_s23, [#allocation3]  }
  0x1a   :  { %s608_s29 = scalar_lea.vmem %s42_s25, 256  ;;  %p613_p11 = scmp.lt.s32.totalorder %s42_s25, %s42_s25 }
  0x1b   :  { %p609_p10 = scmp.ne.s32.totalorder %s42_s25, %s608_s29  ;;  %p614_p12 = scmp.lt.s32.totalorder %s608_s29, %s608_s29 }
  0x1d   :  { %p615_p13 = por %p614_p12, %p613_p11 }
  0x1f   :  { %p616_p0 = pnand %p615_p13, %p609_p10 }
  0x21   :  { %619 = shalt.err (!%p616_p0)
}
  0x22   :  { %44 = dma.hbm_to_vmem [thread:$0]  %s734_s2, 256, %s42_s25, [#allocation6]  }
  0x23   :  { %s673_s5 = smov [#allocation8]  }
  0x24   :  { %s51_s6 = sshll.u32 %s673_s5, 4  ;;  %s52_s6 = int_to_ptr.vmem [resolvable:$true] %s51_s6 }
  0x25   :  { %s628_s7 = scalar_lea.vmem %s52_s6, 128  ;;  %p633_p2 = scmp.lt.s32.totalorder %s52_s6, %s52_s6 }
  0x26   :  { %p629_p1 = scmp.ne.s32.totalorder %s52_s6, %s628_s7  ;;  %p634_p3 = scmp.lt.s32.totalorder %s628_s7, %s628_s7 }
  0x28   :  { %p635_p4 = por %p634_p3, %p633_p2 }
  0x2a   :  { %p636_p5 = pnand %p635_p4, %p629_p1 }
  0x2c   :  { %639 = shalt.err (!%p636_p5)
}
  0x2d   :  { %54 = dma.hbm_to_vmem [thread:$0]  %s735_s3, 128, %s52_s6, [#allocation9]  }
  0x2e   :  { %660 = dma.done.wait [#allocation3], 128  }
  0x2f   :  { %661 = vsyncadd [#allocation3], 4294967168 }
  0x30   :  { %662 = dma.done.wait [#allocation6], 20736  }
  0x31   :  { %663 = vsyncadd [#allocation6], 4294946560 }
  0x32   :  { %664 = dma.done.wait [#allocation9], 128  }
  0x33   :  { %665 = vsyncadd [#allocation9], 4294967168  ;;  %v674_v0 = vmov 0.0   ;;  %v100_v1 = vld [vmem:[#allocation5 + $0xf8] sm:$0xff]  ;;  %v99_v2 = vld [vmem:[#allocation5 + $0xf0] sm:$0xff]  ;;  %s675_s2 = smov [#allocation10]  }
  0x34   :  { %277 = vmatprep.mubr.f32.mxu0 %v674_v0  ;;  %v98_v3 = vld [vmem:[#allocation5 + $0xe8] sm:$0xff]  ;;  %213 = vmatprep.subr.mxu0 %v100_v1  ;;  %v97_v4 = vld [vmem:[#allocation5 + $0xe0] sm:$0xff]  ;;  %v96_v5 = vld [vmem:[#allocation5 + $0xd8] sm:$0xff]  ;;  %s495_s3 = sshll.u32 %s675_s2, 4  ;;  %s496_s3 = int_to_ptr.vmem [resolvable:$true] %s495_s3 }
  0x35   :  { %214 = vmatpush1.msra.mxu0 %v99_v2  ;;  %v95_v6 = vld [vmem:[#allocation5 + $0xd0] sm:$0xff]  ;;  %v94_v7 = vld [vmem:[#allocation5 + $0xc8] sm:$0xff]  ;;  %v93_v8 = vld [vmem:[#allocation5 + $0xc0] sm:$0xff]  ;;  %s640_s9 = scalar_lea.vmem %s496_s3, 128  ;;  %p645_p7 = scmp.lt.s32.totalorder %s496_s3, %s496_s3 }
  0x36   :  { %215 = vmatprep.subr.mxu0 %v98_v3  ;;  %v92_v9 = vld [vmem:[#allocation5 + $0xb8] sm:$0xff]  ;;  %v91_v10 = vld [vmem:[#allocation5 + $0xb0] sm:$0xff]  ;;  %v90_v11 = vld [vmem:[#allocation5 + $0xa8] sm:$0xff]  ;;  %p641_p6 = scmp.ne.s32.totalorder %s496_s3, %s640_s9  ;;  %p646_p8 = scmp.lt.s32.totalorder %s640_s9, %s640_s9 }
  0x37   :  { %216 = vmatpush1.msra.mxu0 %v97_v4  ;;  %v89_v12 = vld [vmem:[#allocation5 + $0xa0] sm:$0xff]  ;;  %v88_v13 = vld [vmem:[#allocation5 + $0x98] sm:$0xff]  ;;  %v87_v14 = vld [vmem:[#allocation5 + $0x90] sm:$0xff] }
  0x38   :  { %217 = vmatprep.subr.mxu0 %v96_v5  ;;  %v132_v15 = vld [vmem:[#allocation5 + $0x1f8] sm:$0xff]  ;;  %v131_v16 = vld [vmem:[#allocation5 + $0x1f0] sm:$0xff]  ;;  %v130_v17 = vld [vmem:[#allocation5 + $0x1e8] sm:$0xff]  ;;  %p647_p9 = por %p646_p8, %p645_p7 }
  0x39   :  { %218 = vmatpush1.msra.mxu0 %v95_v6  ;;  %v86_v18 = vld [vmem:[#allocation5 + $0x88] sm:$0xff]  ;;  %297 = vmatprep.subr.mxu1 %v132_v15  ;;  %v129_v19 = vld [vmem:[#allocation5 + $0x1e0] sm:$0xff]  ;;  %v128_v21 = vld [vmem:[#allocation5 + $0x1d8] sm:$0xff] }
  0x3a   :  { %219 = vmatprep.subr.mxu0 %v94_v7  ;;  %v85_v20 = vld [vmem:[#allocation5 + $0x80] sm:$0xff]  ;;  %298 = vmatpush1.msra.mxu1 %v131_v16  ;;  %v84_v22 = vld [vmem:[#allocation5 + $0x78] sm:$0xff]  ;;  %v127_v23 = vld [vmem:[#allocation5 + $0x1d0] sm:$0xff]  ;;  %p648_p10 = pnand %p647_p9, %p641_p6 }
  0x3b   :  { %220 = vmatpush1.msra.mxu0 %v93_v8  ;;  %299 = vmatprep.subr.mxu1 %v130_v17  ;;  %v83_v24 = vld [vmem:[#allocation5 + $0x70] sm:$0xff]  ;;  %v126_v25 = vld [vmem:[#allocation5 + $0x1c8] sm:$0xff]  ;;  %v125_v27 = vld [vmem:[#allocation5 + $0x1c0] sm:$0xff] }
  0x3c   :  { %221 = vmatprep.subr.mxu0 %v92_v9  ;;  %300 = vmatpush1.msra.mxu1 %v129_v19  ;;  %v82_v26 = vld [vmem:[#allocation5 + $0x68] sm:$0xff]  ;;  %v81_v28 = vld [vmem:[#allocation5 + $0x60] sm:$0xff]  ;;  %v124_v29 = vld [vmem:[#allocation5 + $0x1b8] sm:$0xff] }
  0x3d   :  { %222 = vmatpush1.msra.mxu0 %v91_v10  ;;  %301 = vmatprep.subr.mxu1 %v128_v21  ;;  %v80_v30 = vld [vmem:[#allocation5 + $0x58] sm:$0xff]  ;;  %v123_v31 = vld [vmem:[#allocation5 + $0x1b0] sm:$0xff]  ;;  %v122_v33 = vld [vmem:[#allocation5 + $0x1a8] sm:$0xff] }
  0x3e   :  { %223 = vmatprep.subr.mxu0 %v90_v11  ;;  %302 = vmatpush1.msra.mxu1 %v127_v23  ;;  %v79_v32 = vld [vmem:[#allocation5 + $0x50] sm:$0xff]  ;;  %v78_v34 = vld [vmem:[#allocation5 + $0x48] sm:$0xff]  ;;  %v121_v35 = vld [vmem:[#allocation5 + $0x1a0] sm:$0xff] }
  0x3f   :  { %224 = vmatpush1.msra.mxu0 %v89_v12  ;;  %303 = vmatprep.subr.mxu1 %v126_v25  ;;  %v77_v36 = vld [vmem:[#allocation5 + $0x40] sm:$0xff]  ;;  %v120_v37 = vld [vmem:[#allocation5 + $0x198] sm:$0xff]  ;;  %v119_v39 = vld [vmem:[#allocation5 + $0x190] sm:$0xff] }
  0x40   :  { %225 = vmatprep.subr.mxu0 %v88_v13  ;;  %304 = vmatpush1.msra.mxu1 %v125_v27  ;;  %v76_v38 = vld [vmem:[#allocation5 + $0x38] sm:$0xff]  ;;  %v75_v40 = vld [vmem:[#allocation5 + $0x30] sm:$0xff]  ;;  %v118_v41 = vld [vmem:[#allocation5 + $0x188] sm:$0xff] }
  0x41   :  { %226 = vmatpush1.msra.mxu0 %v87_v14  ;;  %305 = vmatprep.subr.mxu1 %v124_v29  ;;  %v74_v42 = vld [vmem:[#allocation5 + $0x28] sm:$0xff]  ;;  %v117_v43 = vld [vmem:[#allocation5 + $0x180] sm:$0xff]  ;;  %v116_v45 = vld [vmem:[#allocation5 + $0x178] sm:$0xff] }
  0x42   :  { %227 = vmatprep.subr.mxu0 %v86_v18  ;;  %306 = vmatpush1.msra.mxu1 %v123_v31  ;;  %v73_v44 = vld [vmem:[#allocation5 + $0x20] sm:$0xff]  ;;  %v72_v46 = vld [vmem:[#allocation5 + $0x18] sm:$0xff]  ;;  %v115_v47 = vld [vmem:[#allocation5 + $0x170] sm:$0xff] }
  0x43   :  { %228 = vmatpush1.msra.mxu0 %v85_v20  ;;  %307 = vmatprep.subr.mxu1 %v122_v33  ;;  %v71_v48 = vld [vmem:[#allocation5 + $0x10] sm:$0xff]  ;;  %v114_v49 = vld [vmem:[#allocation5 + $0x168] sm:$0xff]  ;;  %v113_v51 = vld [vmem:[#allocation5 + $0x160] sm:$0xff] }
  0x44   :  { %229 = vmatprep.subr.mxu0 %v84_v22  ;;  %308 = vmatpush1.msra.mxu1 %v121_v35  ;;  %v70_v50 = vld [vmem:[#allocation5 + $0x8] sm:$0xff]  ;;  %v69_v52 = vld [vmem:[#allocation5] sm:$0xff]  ;;  %v112_v53 = vld [vmem:[#allocation5 + $0x158] sm:$0xff] }
  0x45   :  { %230 = vmatpush1.msra.mxu0 %v83_v24  ;;  %309 = vmatprep.subr.mxu1 %v120_v37  ;;  %v67_v54 = vld [vmem:[#allocation2] sm:$0xff]  ;;  %v111_v55 = vld [vmem:[#allocation5 + $0x150] sm:$0xff]  ;;  %v110_v56 = vld [vmem:[#allocation5 + $0x148] sm:$0xff] }
  0x46   :  { %231 = vmatprep.subr.mxu0 %v82_v26  ;;  %310 = vmatpush1.msra.mxu1 %v119_v39  ;;  %v109_v57 = vld [vmem:[#allocation5 + $0x140] sm:$0xff]  ;;  %v108_v58 = vld [vmem:[#allocation5 + $0x138] sm:$0xff]  ;;  %v107_v59 = vld [vmem:[#allocation5 + $0x130] sm:$0xff] }
  0x47   :  { %232 = vmatpush1.msra.mxu0 %v81_v28  ;;  %311 = vmatprep.subr.mxu1 %v118_v41  ;;  %v106_v60 = vld [vmem:[#allocation5 + $0x128] sm:$0xff]  ;;  %v105_v61 = vld [vmem:[#allocation5 + $0x120] sm:$0xff]  ;;  %v104_v62 = vld [vmem:[#allocation5 + $0x118] sm:$0xff] }
  0x48   :  { %233 = vmatprep.subr.mxu0 %v80_v30  ;;  %312 = vmatpush1.msra.mxu1 %v117_v43  ;;  %v103_v63 = vld [vmem:[#allocation5 + $0x110] sm:$0xff]  ;;  %v102_v0 = vld [vmem:[#allocation5 + $0x108] sm:$0xff]  ;;  %v101_v1 = vld [vmem:[#allocation5 + $0x100] sm:$0xff] }
  0x49   :  { %234 = vmatpush1.msra.mxu0 %v79_v32  ;;  %313 = vmatprep.subr.mxu1 %v116_v45  ;;  %v164_v2 = vld [vmem:[#allocation5 + $0x2f8] sm:$0xff]  ;;  %v163_v3 = vld [vmem:[#allocation5 + $0x2f0] sm:$0xff]  ;;  %v162_v4 = vld [vmem:[#allocation5 + $0x2e8] sm:$0xff] }
  0x4a   :  { %235 = vmatprep.subr.mxu0 %v78_v34  ;;  %314 = vmatpush1.msra.mxu1 %v115_v47  ;;  %v161_v5 = vld [vmem:[#allocation5 + $0x2e0] sm:$0xff]  ;;  %v160_v6 = vld [vmem:[#allocation5 + $0x2d8] sm:$0xff]  ;;  %v159_v7 = vld [vmem:[#allocation5 + $0x2d0] sm:$0xff]  ;;  %v203_v47 = vlaneseq }
  0x4b   :  { %236 = vmatpush1.msra.mxu0 %v77_v36  ;;  %315 = vmatprep.subr.mxu1 %v114_v49  ;;  %v158_v8 = vld [vmem:[#allocation5 + $0x2c8] sm:$0xff]  ;;  %v157_v9 = vld [vmem:[#allocation5 + $0x2c0] sm:$0xff]  ;;  %v156_v10 = vld [vmem:[#allocation5 + $0x2b8] sm:$0xff] }
  0x4c   :  { %237 = vmatprep.subr.mxu0 %v76_v38  ;;  %316 = vmatpush1.msra.mxu1 %v113_v51  ;;  %v155_v11 = vld [vmem:[#allocation5 + $0x2b0] sm:$0xff]  ;;  %v154_v12 = vld [vmem:[#allocation5 + $0x2a8] sm:$0xff]  ;;  %v153_v13 = vld [vmem:[#allocation5 + $0x2a0] sm:$0xff] }
  0x4d   :  { %238 = vmatpush1.msra.mxu0 %v75_v40  ;;  %317 = vmatprep.subr.mxu1 %v112_v53  ;;  %v152_v14 = vld [vmem:[#allocation5 + $0x298] sm:$0xff]  ;;  %v151_v15 = vld [vmem:[#allocation5 + $0x290] sm:$0xff]  ;;  %v150_v16 = vld [vmem:[#allocation5 + $0x288] sm:$0xff] }
  0x4e   :  { %239 = vmatprep.subr.mxu0 %v74_v42  ;;  %318 = vmatpush1.msra.mxu1 %v111_v55  ;;  %v149_v17 = vld [vmem:[#allocation5 + $0x280] sm:$0xff]  ;;  %v148_v18 = vld [vmem:[#allocation5 + $0x278] sm:$0xff]  ;;  %v147_v19 = vld [vmem:[#allocation5 + $0x270] sm:$0xff] }
  0x4f   :  { %240 = vmatpush1.msra.mxu0 %v73_v44  ;;  %319 = vmatprep.subr.mxu1 %v110_v56  ;;  %v146_v20 = vld [vmem:[#allocation5 + $0x268] sm:$0xff]  ;;  %v145_v21 = vld [vmem:[#allocation5 + $0x260] sm:$0xff]  ;;  %v144_v22 = vld [vmem:[#allocation5 + $0x258] sm:$0xff] }
  0x50   :  { %241 = vmatprep.subr.mxu0 %v72_v46  ;;  %320 = vmatpush1.msra.mxu1 %v109_v57  ;;  %v143_v23 = vld [vmem:[#allocation5 + $0x250] sm:$0xff]  ;;  %v142_v24 = vld [vmem:[#allocation5 + $0x248] sm:$0xff]  ;;  %v141_v25 = vld [vmem:[#allocation5 + $0x240] sm:$0xff] }
  0x51   :  { %242 = vmatpush1.msra.mxu0 %v71_v48  ;;  %321 = vmatprep.subr.mxu1 %v108_v58  ;;  %v140_v26 = vld [vmem:[#allocation5 + $0x238] sm:$0xff]  ;;  %v139_v27 = vld [vmem:[#allocation5 + $0x230] sm:$0xff]  ;;  %v138_v28 = vld [vmem:[#allocation5 + $0x228] sm:$0xff]  ;;  %v714_v48 = vshrl.u32 %v203_v47, 7 }
  0x52   :  { %243 = vmatprep.subr.mxu0 %v70_v50  ;;  %322 = vmatpush1.msra.mxu1 %v107_v59  ;;  %v137_v29 = vld [vmem:[#allocation5 + $0x220] sm:$0xff]  ;;  %v136_v30 = vld [vmem:[#allocation5 + $0x218] sm:$0xff]  ;;  %v135_v31 = vld [vmem:[#allocation5 + $0x210] sm:$0xff] }
  0x53   :  { %244 = vmatpush1.msra.mxu0 %v69_v52  ;;  %323 = vmatprep.subr.mxu1 %v106_v60  ;;  %v134_v32 = vld [vmem:[#allocation5 + $0x208] sm:$0xff]  ;;  %v133_v33 = vld [vmem:[#allocation5 + $0x200] sm:$0xff]  ;;  %v196_v34 = vld [vmem:[#allocation5 + $0x4f0] sm:$0xff]  ;;  %v205_v49 = vsub.s32 0, %v714_v48  ;;  %v209_v51 = vsub.s32 1, %v714_v48 }
  0x54   :  { %278 = vmatmul.mubr.f32.vlgmr.msra.gmra.mxu0 %v67_v54  ;;  %324 = vmatpush1.msra.mxu1 %v105_v61  ;;  %v180_v35 = vld [vmem:[#allocation5 + $0x3f0] sm:$0xff]  ;;  %v195_v36 = vld [vmem:[#allocation5 + $0x4e0] sm:$0xff] }
  0x55   :  { %325 = vmatprep.subr.mxu1 %v104_v62  ;;  %507 = vmatprep.subr.mxu0 %v196_v34  ;;  %v179_v37 = vld [vmem:[#allocation5 + $0x3e0] sm:$0xff]  ;;  %v194_v38 = vld [vmem:[#allocation5 + $0x4d0] sm:$0xff]  ;;  %v369_v34 = vand.u32 127, %v203_v47 }
  0x56   :  { %326 = vmatpush1.msra.mxu1 %v103_v63  ;;  %508 = vmatpush3.msra.mxu0 %v180_v35  ;;  %v178_v39 = vld [vmem:[#allocation5 + $0x3d0] sm:$0xff]  ;;  %v193_v40 = vld [vmem:[#allocation5 + $0x4c0] sm:$0xff] }
  0x57   :  { %327 = vmatprep.subr.mxu1 %v102_v0  ;;  %509 = vmatprep.subr.mxu0 %v195_v36  ;;  %v177_v41 = vld [vmem:[#allocation5 + $0x3c0] sm:$0xff]  ;;  %v192_v42 = vld [vmem:[#allocation5 + $0x4b0] sm:$0xff]  ;;  %vm449_vm2 = vcmp.lt.s32.totalorder %v369_v34, 4  ;;  %vm452_vm3 = vcmp.eq.s32.totalorder %v369_v34, 64  ;;  %vm484_vm4 = vcmp.eq.s32.totalorder %v369_v34, 65 }
  0x58   :  { %328 = vmatpush1.msra.mxu1 %v101_v1  ;;  %510 = vmatpush3.msra.mxu0 %v179_v37  ;;  %v176_v43 = vld [vmem:[#allocation5 + $0x3b0] sm:$0xff]  ;;  %v191_v44 = vld [vmem:[#allocation5 + $0x4a0] sm:$0xff] }
  0x59   :  { %329 = vmatprep.subr.mxu1 %v164_v2  ;;  %511 = vmatprep.subr.mxu0 %v194_v38  ;;  %v175_v45 = vld [vmem:[#allocation5 + $0x3a0] sm:$0xff]  ;;  %v190_v46 = vld [vmem:[#allocation5 + $0x490] sm:$0xff] }
  0x5a   :  { %330 = vmatpush2.msra.mxu1 %v163_v3  ;;  %512 = vmatpush3.msra.mxu0 %v178_v39  ;;  %v197_v50 = vld [vmem:[#allocation7] ss:$8 sm:$0x3]  ;;  %v174_v60 = vld [vmem:[#allocation5 + $0x390] sm:$0xff] }
  0x5b   :  { %331 = vmatprep.subr.mxu1 %v162_v4  ;;  %513 = vmatprep.subr.mxu0 %v193_v40  ;;  %v206_v52 = vrot.slane %v197_v50, %v205_v49  ;;  %v210_v53 = vrot.slane %v197_v50, %v209_v51  ;;  %v189_v61 = vld [vmem:[#allocation5 + $0x480] sm:$0xff]  ;;  %v188_v63 = vld [vmem:[#allocation5 + $0x470] sm:$0xff] }
  0x5c   :  { %332 = vmatpush2.msra.mxu1 %v161_v5  ;;  %514 = vmatpush3.msra.mxu0 %v177_v41  ;;  %v173_v62 = vld [vmem:[#allocation5 + $0x380] sm:$0xff]  ;;  %v172_v0 = vld [vmem:[#allocation5 + $0x370] sm:$0xff] }
  0x5d   :  { %333 = vmatprep.subr.mxu1 %v160_v6  ;;  %515 = vmatprep.subr.mxu0 %v192_v42  ;;  %v187_v1 = vld [vmem:[#allocation5 + $0x460] sm:$0xff]  ;;  %v186_v3 = vld [vmem:[#allocation5 + $0x450] sm:$0xff] }
  0x5e   :  { %334 = vmatpush2.msra.mxu1 %v159_v7  ;;  %516 = vmatpush3.msra.mxu0 %v176_v43  ;;  %v171_v2 = vld [vmem:[#allocation5 + $0x360] sm:$0xff]  ;;  %v170_v4 = vld [vmem:[#allocation5 + $0x350] sm:$0xff] }
  0x5f   :  { %335 = vmatprep.subr.mxu1 %v158_v8  ;;  %517 = vmatprep.subr.mxu0 %v191_v44  ;;  %v185_v5 = vld [vmem:[#allocation5 + $0x440] sm:$0xff]  ;;  %v184_v7 = vld [vmem:[#allocation5 + $0x430] sm:$0xff] }
  0x60   :  { %336 = vmatpush2.msra.mxu1 %v157_v9  ;;  %518 = vmatpush3.msra.mxu0 %v175_v45  ;;  %v169_v6 = vld [vmem:[#allocation5 + $0x340] sm:$0xff]  ;;  %v168_v8 = vld [vmem:[#allocation5 + $0x330] sm:$0xff] }
  0x61   :  { %337 = vmatprep.subr.mxu1 %v156_v10  ;;  %519 = vmatprep.subr.mxu0 %v190_v46  ;;  %v183_v9 = vld [vmem:[#allocation5 + $0x420] sm:$0xff] }
  0x62   :  { %338 = vmatpush2.msra.mxu1 %v155_v11  ;;  %520 = vmatpush3.msra.mxu0 %v174_v60  ;;  %v167_v10 = vld [vmem:[#allocation5 + $0x320] sm:$0xff]  ;;  %v182_v11 = vld [vmem:[#allocation5 + $0x410] sm:$0xff] }
  0x63   :  { %339 = vmatprep.subr.mxu1 %v154_v12  ;;  %521 = vmatprep.subr.mxu0 %v189_v61  ;;  %v166_v12 = vld [vmem:[#allocation5 + $0x310] sm:$0xff]  ;;  %v199_v42 = vld [vmem:[#allocation7 + $0x1] ss:$8 sm:$0x3] }
  0x64   :  { %340 = vmatpush2.msra.mxu1 %v153_v13  ;;  %522 = vmatpush3.msra.mxu0 %v173_v62  ;;  %v181_v13 = vld [vmem:[#allocation5 + $0x400] sm:$0xff]  ;;  %v290_v43 = vrot.slane %v199_v42, %v205_v49  ;;  %v294_v44 = vrot.slane %v199_v42, %v209_v51 }
  0x65   :  { %341 = vmatprep.subr.mxu1 %v152_v14  ;;  %523 = vmatprep.subr.mxu0 %v188_v63  ;;  %v165_v14 = vld [vmem:[#allocation5 + $0x300] sm:$0xff] }
  0x66   :  { %342 = vmatpush2.msra.mxu1 %v151_v15  ;;  %524 = vmatpush3.msra.mxu0 %v172_v0  ;;  %v201_v15 = vld [vmem:[#allocation7 + $0xa] ss:$0 sm:$0xff] }
  0x67   :  { %343 = vmatprep.subr.mxu1 %v150_v16  ;;  %525 = vmatprep.subr.mxu0 %v187_v1  ;;  %v457_v16 = vand.u32 2147483647, %v201_v15  ;;  %vm455_vm1 = vcmp.ne.f32.partialorder %v201_v15, %v201_v15 }
  0x68   :  { %344 = vmatpush2.msra.mxu1 %v149_v17  ;;  %526 = vmatpush3.msra.mxu0 %v171_v2 }
  0x69   :  { %345 = vmatprep.subr.mxu1 %v148_v18  ;;  %527 = vmatprep.subr.mxu0 %v186_v3  ;;  %v458_v17 = vsub.f32 0.0, %v457_v16 }
  0x6a   :  { %346 = vmatpush2.msra.mxu1 %v147_v19  ;;  %528 = vmatpush3.msra.mxu0 %v170_v4 }
  0x6b   :  { %347 = vmatprep.subr.mxu1 %v146_v20  ;;  %529 = vmatprep.subr.mxu0 %v185_v5  ;;  %v459_v18 = vmul.f32 1.442695, %v458_v17 }
  0x6c   :  { %348 = vmatpush2.msra.mxu1 %v145_v21  ;;  %530 = vmatpush3.msra.mxu0 %v169_v6 }
  0x6d   :  { %349 = vmatprep.subr.mxu1 %v144_v22  ;;  %531 = vmatprep.subr.mxu0 %v184_v7  ;;  %550 = vpow2.f32 %v459_v18 }
  0x6e   :  { %350 = vmatpush2.msra.mxu1 %v143_v23  ;;  %532 = vmatpush3.msra.mxu0 %v168_v8 }
  0x6f   :  { %351 = vmatprep.subr.mxu1 %v142_v24  ;;  %533 = vmatprep.subr.mxu0 %v183_v9 }
  0x70   :  { %352 = vmatpush2.msra.mxu1 %v141_v25  ;;  %534 = vmatpush3.msra.mxu0 %v167_v10 }
  0x71   :  { %353 = vmatprep.subr.mxu1 %v140_v26  ;;  %535 = vmatprep.subr.mxu0 %v182_v11  ;;  %v454_v26 = vmax.f32 %v201_v15, 0.0 }
  0x72   :  { %354 = vmatpush2.msra.mxu1 %v139_v27  ;;  %536 = vmatpush3.msra.mxu0 %v166_v12 }
  0x73   :  { %355 = vmatprep.subr.mxu1 %v138_v28  ;;  %537 = vmatprep.subr.mxu0 %v181_v13 }
  0x74   :  { %356 = vmatpush2.msra.mxu1 %v137_v29  ;;  %538 = vmatpush3.msra.mxu0 %v165_v14 }
  0x75   :  { %357 = vmatprep.subr.mxu1 %v136_v30  ;;  %v68_v30 = vld [vmem:[#allocation8] sm:$0xff] }
  0x76   :  { %358 = vmatpush2.msra.mxu1 %v135_v31  ;;  %v479_v35 = vmul.f32 %v68_v30, %v68_v30 }
  0x77   :  { %359 = vmatprep.subr.mxu1 %v134_v32 }
  0x78   :  { %360 = vmatpush2.msra.mxu1 %v133_v33  ;;  %v480_v38 = vmul.f32 -0.5, %v479_v35 }
  0x7a   :  { %v551_v19 = vpop.eup %550 }
  0x7b   :  { %v461_v20 = vadd.f32 1.0, %v551_v19  ;;  %v464_v21 = vmul.f32 -0.5, %v551_v19  ;;  %v467_v23 = vand.u32 2147483647, %v551_v19 }
  0x7d   :  { %552 = vlog2.f32 %v461_v20  ;;  %v465_v22 = vadd.f32 1.0, %v464_v21  ;;  %vm468_vm0 = vcmp.lt.f32.partialorder %v467_v23, 0.0004427343 }
  0x7f   :  { %v466_v24 = vmul.f32 %v551_v19, %v465_v22 }
  0x8a   :  { %v553_v25 = vpop.eup %552 }
  0x8b   :  { %v463_v27 = vmul.f32 0.6931472, %v553_v25 }
  0x8d   :  { %v469_v28 = vsel %vm468_vm0, %v466_v24, %v463_v27 }
  0x8e   :  { %v470_v29 = vadd.f32 %v469_v28, %v454_v26 }
  0x90   :  { %v471_v31 = vsel %vm455_vm1, %v201_v15, %v470_v29 }
  0x91   :  { %v472_v32 = vmul.f32 %v471_v31, %v68_v30  ;;  %554 = vlog2.f32 %v471_v31 }
  0x9e   :  { %v555_v33 = vpop.eup %554 }
  0x9f   :  { %v475_v36 = vmul.f32 0.6931472, %v555_v33 }
  0xa1   :  { %v476_v37 = vsub.f32 0.0, %v475_v36 }
  0xa3   :  { %v506_v39 = vadd.f32 -0.9189385, %v476_v37 }
  0xa5   :  { %v478_v40 = vsel %vm449_vm2, %v506_v39, 0.0 }
  0xa6   :  { %v481_v41 = vadd.f32 %v480_v38, %v478_v40 }
  0xa8   :  { %482 = vadd.xlane.f32.xlu0 %v481_v41 }
 0x114   :  { %v279_v54 = vpop.f32.mrf.mxu0 }
 0x115   :  { %v280_v55 = vadd.f32 %v279_v54, %v206_v52 }
 0x116   :  { %v281_v56 = vpop.f32.mrf.mxu0 }
 0x117   :  { %v282_v57 = vadd.f32 %v281_v56, %v210_v53  ;;  %v284_v59 = vmax.f32 %v280_v55, 0.0  ;;  %v200_v56 = vld [vmem:[#allocation7 + $0x2] ss:$0 sm:$0xff] }
 0x119   :  { %v285_v58 = vmax.f32 %v282_v57, 0.0 }
 0x11b   :  { %361 = vmatprep.mubr.f32.mxu1 %v285_v58 }
 0x11c   :  { %362 = vmatmul.mubr.f32.vlgmr.msra.gmra.mxu1 %v284_v59 }
 0x131   :  { %v483_v48 = vpop.xlane.xlu0 %482 }
 0x132   :  { %v485_v62 = vsel %vm484_vm4, %v483_v48, 0.0 }
 0x1dc   :  { %v363_v45 = vpop.f32.mrf.mxu1 }
 0x1dd   :  { %v364_v46 = vadd.f32 %v363_v45, %v290_v43 }
 0x1de   :  { %v365_v47 = vpop.f32.mrf.mxu1 }
 0x1df   :  { %556 = vtanh.f32 %v364_v46  ;;  %v366_v50 = vadd.f32 %v365_v47, %v294_v44 }
 0x1e1   :  { %v378_v52 = vmax.f32 %v366_v50, 0.0 }
 0x1e3   :  { %443 = vmatprep.mubr.f32.mxu0 %v378_v52 }
 0x1ec   :  { %v557_v53 = vpop.eup %556 }
 0x1ed   :  { %v377_v54 = vmax.f32 %v557_v53, 0.0 }
 0x1ef   :  { %444 = vmatmul.mubr.f32.vlgmr.msra.gmra.mxu0 %v377_v54 }
 0x2af   :  { %v539_v55 = vpop.f32.mrf.mxu0 }
 0x2b1   :  { %v540_v57 = vpop.f32.mrf.mxu0 }
 0x2b2   :  { %v541_v58 = vadd.f32 %v540_v57, %v539_v55 }
 0x2b4   :  { %v446_v59 = vadd.f32 %v541_v58, %v200_v56 }
 0x2b6   :  { %558 = vtanh.f32 %v446_v59  ;;  %v453_v61 = vsel %vm452_vm3, %v446_v59, 0.0 }
 0x2c3   :  { %v559_v49 = vpop.eup %558 }
 0x2c4   :  { %v451_v51 = vsel %vm449_vm2, %v559_v49, 0.0 }
 0x2c5   :  { %v473_v60 = vadd.f32 %v472_v32, %v451_v51 }
 0x2c7   :  { %v486_v63 = vadd.f32 %v473_v60, %v453_v61 }
 0x2c9   :  { %v487_v0 = vadd.f32 %v486_v63, %v485_v62 }
 0x2cb   :  { %488 = vst [vmem:[#allocation10] sm:$0xff] %v487_v0 }
 0x2cc   :  { %651 = shalt.err (!%p648_p10)
}
 0x2cd   :  { %498 = dma.vmem_to_hbm [thread:$0]  %s496_s3, 128, %s736_s4, [#allocation4]  }
 0x2ce   :  { %666 = dma.done.wait [#allocation4], 128  }
 0x2cf   :  { %667 = vsyncadd [#allocation4], 4294967168 }
 0x2d0   :  { %502 = vsyncpa [#allocation3], 1 }
 0x2d1   :  { %503 = vsyncpa [#allocation6], 1 }
 0x2d2   :  { %504 = vsyncpa [#allocation9], 1 }
 0x2d3   :  { %505 = vsyncpa [#allocation4], 1 }

</bundles_post_ra>
